<compile_context>
chip_gen: v7x
topology: tpu7x:2x2x1
jax: 0.10.0
libtpu: 0.0.40
codegen_flags: <defaults>
</compile_context>

<pallas_src>
import functools

import jax
import jax.numpy as jnp
from jax.experimental import pallas as pl
from jax.experimental.pallas import tpu as pltpu

LANE = 128


def _round_up(n, m):
    return ((n + m - 1) // m) * m


def _ncde_mlp_kernel(*refs, num_hidden_layers):
    """refs = (x_ref, w0, b0, w1, b1, ..., w_last, b_last, out_ref)."""
    x_ref = refs[0]
    out_ref = refs[-1]
    params = refs[1:-1]

    h = x_ref[...].astype(jnp.float32)

    # Hidden MyLinear layers + ReLU (unrolled at trace time).
    # Matmuls in bf16 (native MXU mode), accumulate in f32; bias/ReLU in f32.
    for i in range(num_hidden_layers):
        w = params[2 * i][...]            # bf16 (in_pad, out_pad)
        b = params[2 * i + 1][...]        # f32  (1, out_pad)
        h = jnp.dot(h.astype(jnp.bfloat16), w,
                    preferred_element_type=jnp.float32) + b
        h = jnp.maximum(h, 0.0)

    # Last MyLinear layer (no activation).
    w_last = params[-2][...]
    b_last = params[-1][...]
    h = jnp.dot(h.astype(jnp.bfloat16), w_last,
                preferred_element_type=jnp.float32) + b_last

    out_ref[...] = h.astype(out_ref.dtype)


def ncde_func_forward(t, x, params, *, hidden_dim, data_feature, tile_b=128):
    """Pallas implementation of NCDE_func.forward.

    Args:
      t: unused (the NCDE vector field ignores t; kept for signature parity).
      x: (B, hidden_dim) float32 hidden state.
      params: list of (W, b) pairs; W is (in_dim, out_dim) (i.e. torch W^T),
              b is (1, out_dim).  Last pair maps to data_feature * hidden_dim.
    Returns:
      (B, hidden_dim, data_feature) float32.
    """
    del t  # NCDE vector field ignores t.
    B, in_dim = x.shape
    assert in_dim == hidden_dim
    out_dim = data_feature * hidden_dim
    num_hidden_layers = len(params) - 1

    # --- batch / lane padding (zero padding is inert through the MLP) -------
    b_pad = _round_up(B, tile_b)
    in_pad = _round_up(hidden_dim, LANE)

    x_pad = jnp.zeros((b_pad, in_pad), jnp.float32)
    x_pad = x_pad.at[:B, :hidden_dim].set(x.astype(jnp.float32))

    flat_params = []
    cur_in_pad = in_pad
    for w, b in params:
        w_in, w_out = w.shape
        o_pad = _round_up(w_out, LANE)
        w_p = jnp.zeros((cur_in_pad, o_pad), jnp.bfloat16)
        w_p = w_p.at[:w_in, :w_out].set(w.astype(jnp.bfloat16))
        b_p = jnp.zeros((1, o_pad), jnp.float32)
        b_p = b_p.at[:, :w_out].set(b.astype(jnp.float32))
        flat_params += [w_p, b_p]
        cur_in_pad = o_pad
    out_pad = cur_in_pad

    # --- BlockSpecs ----------------------------------------------------------
    # x / out: tiled over batch, lane-dense (128-multiple) last dims.
    # Weights & biases: one full-array VMEM-resident block for every step.
    # TODO(synk): for very large last layers (hidden_hidden_dim x
    # data_feature*hidden_dim beyond a few MiB) add a second grid axis over the
    # output N dimension and single-buffer the resident weights so the
    # footprint fits v7x's 64 MiB VMEM.
    in_specs = [pl.BlockSpec((tile_b, in_pad), lambda i: (i, 0))]
    for p in flat_params:
        in_specs.append(pl.BlockSpec(p.shape, lambda i: (0, 0)))
    out_specs = pl.BlockSpec((tile_b, out_pad), lambda i: (i, 0))

    kernel = functools.partial(_ncde_mlp_kernel,
                               num_hidden_layers=num_hidden_layers)

    flat_out = pl.pallas_call(
        kernel,
        out_shape=jax.ShapeDtypeStruct((b_pad, out_pad), jnp.float32),
        grid_spec=pltpu.PrefetchScalarGridSpec(
            num_scalar_prefetch=0,
            grid=(b_pad // tile_b,),
            in_specs=in_specs,
            out_specs=out_specs,
        ),
        compiler_params=pltpu.CompilerParams(
            dimension_semantics=("parallel",),
            vmem_limit_bytes=64 * 1024 * 1024,
        ),
    )(x_pad, *flat_params)

    # Strip padding; same row-major reshape as torch's .reshape.
    out = flat_out[:B, :out_dim]
    return out.reshape(-1, hidden_dim, data_feature)


def init_ncde_params(key, data_feature, hidden_dim, hidden_hidden_dim,
                     num_layers):
    """Deterministic synthetic parameters (MyLinear ~ nn.Linear shapes)."""
    params = []
    in_dim = hidden_dim
    dims = [hidden_hidden_dim] * num_layers + [data_feature * hidden_dim]
    for out_dim in dims:
        key, kw, kb = jax.random.split(key, 3)
        scale = 1.0 / jnp.sqrt(jnp.float32(in_dim))
        w = jax.random.uniform(kw, (in_dim, out_dim), jnp.float32,
                               -scale, scale)
        b = jax.random.uniform(kb, (1, out_dim), jnp.float32, -scale, scale)
        params.append((w, b))
        in_dim = out_dim
    return params


def ncde_reference_bf16(x, params):
    """Pure-JAX reference using the same bf16-matmul / f32-accumulate recipe."""
    h = x.astype(jnp.float32)
    for w, b in params[:-1]:
        h = jnp.dot(h.astype(jnp.bfloat16), w.astype(jnp.bfloat16),
                    preferred_element_type=jnp.float32) + b
        h = jnp.maximum(h, 0.0)
    w, b = params[-1]
    return jnp.dot(h.astype(jnp.bfloat16), w.astype(jnp.bfloat16),
                   preferred_element_type=jnp.float32) + b


def ncde_reference_f32(x, params):
    """Full-precision reference (looser tolerance vs the bf16 kernel)."""
    h = x
    for w, b in params[:-1]:
        h = jnp.maximum(h @ w + b, 0.0)
    w, b = params[-1]
    return h @ w + b


if __name__ == "__main__":
    data_feature = 4
    hidden_dim = 32
    hidden_hidden_dim = 64
    num_layers = 2

    key = jax.random.PRNGKey(0)
    key, kx = jax.random.split(key)
    t = jnp.float32(0.0)  # unused by the vector field

    params = init_ncde_params(key, data_feature, hidden_dim,
                              hidden_hidden_dim, num_layers)

    fwd = jax.jit(functools.partial(ncde_func_forward,
                                    hidden_dim=hidden_dim,
                                    data_feature=data_feature,
                                    tile_b=128))

    # batch=256: 2 grid steps (both v7x TensorCores busy).
    # batch=200: ragged batch, exercises the ceil-div padding path.
    for batch in (256, 200):
        kx, kcur = jax.random.split(kx)
        x = jax.random.normal(kcur, (batch, hidden_dim), jnp.float32)

        out = jax.block_until_ready(fwd(t, x, params))
        assert out.shape == (batch, hidden_dim, data_feature), out.shape

        ref = ncde_reference_bf16(x, params).reshape(-1, hidden_dim,
                                                     data_feature)
        err = float(jnp.max(jnp.abs(out - ref)))
        assert err < 2e-3, f"max abs err vs bf16 reference: {err}"

        ref32 = ncde_reference_f32(x, params).reshape(-1, hidden_dim,
                                                      data_feature)
        err32 = float(jnp.max(jnp.abs(out - ref32)))
        assert err32 < 5e-2, f"max abs err vs f32 reference: {err32}"

    print("KERNEL_OK")
</pallas_src>

<mosaic_0001>
module attributes {stable_mosaic.version = 11 : i64} {
  func.func @_ncde_mlp_kernel(%arg0: i32, %arg1: memref<128x128xf32, #tpu.memory_space<vmem>>, %arg2: memref<128x128xbf16, #tpu.memory_space<vmem>>, %arg3: memref<1x128xf32, #tpu.memory_space<vmem>>, %arg4: memref<128x128xbf16, #tpu.memory_space<vmem>>, %arg5: memref<1x128xf32, #tpu.memory_space<vmem>>, %arg6: memref<128x128xbf16, #tpu.memory_space<vmem>>, %arg7: memref<1x128xf32, #tpu.memory_space<vmem>>, %arg8: memref<128x128xf32, #tpu.memory_space<vmem>>) attributes {dimension_semantics = [#tpu.dimension_semantics<parallel>], iteration_bounds = array<i64: 2>, scalar_prefetch = 0 : i64, scratch_operands = 0 : i64, tpu.core_type = #tpu.core_type<tc>, window_params = [{transform_indices = @transform_0, window_bounds = array<i64: 128, 128>}, {pipeline_mode = #tpu.pipeline_mode<synchronous>, transform_indices = @transform_1, window_bounds = array<i64: 128, 128>}, {pipeline_mode = #tpu.pipeline_mode<synchronous>, transform_indices = @transform_2, window_bounds = array<i64: 1, 128>}, {pipeline_mode = #tpu.pipeline_mode<synchronous>, transform_indices = @transform_3, window_bounds = array<i64: 128, 128>}, {pipeline_mode = #tpu.pipeline_mode<synchronous>, transform_indices = @transform_4, window_bounds = array<i64: 1, 128>}, {pipeline_mode = #tpu.pipeline_mode<synchronous>, transform_indices = @transform_5, window_bounds = array<i64: 128, 128>}, {pipeline_mode = #tpu.pipeline_mode<synchronous>, transform_indices = @transform_6, window_bounds = array<i64: 1, 128>}, {transform_indices = @transform_7, window_bounds = array<i64: 128, 128>}]} {
    %c0 = arith.constant 0 : index
    %c0_0 = arith.constant 0 : index
    %0 = vector.load %arg1[%c0, %c0_0] : memref<128x128xf32, #tpu.memory_space<vmem>>, vector<128x128xf32>
    %c0_1 = arith.constant 0 : index
    %c0_2 = arith.constant 0 : index
    %1 = vector.load %arg2[%c0_1, %c0_2] : memref<128x128xbf16, #tpu.memory_space<vmem>>, vector<128x128xbf16>
    %c0_3 = arith.constant 0 : index
    %c0_4 = arith.constant 0 : index
    %2 = vector.load %arg3[%c0_3, %c0_4] : memref<1x128xf32, #tpu.memory_space<vmem>>, vector<1x128xf32>
    %3 = arith.truncf %0 : vector<128x128xf32> to vector<128x128xbf16>
    %cst = arith.constant dense<0.000000e+00> : vector<128x128xf32>
    %4 = tpu.matmul %3, %1, %cst {dimension_numbers = #tpu.dot_dimension_numbers<[1], [0], [0], [1], [0, 0, 1, 1], [], []>} : vector<128x128xbf16>, vector<128x128xbf16>, vector<128x128xf32> -> vector<128x128xf32>
    %5 = vector.broadcast %2 : vector<1x128xf32> to vector<128x128xf32>
    %6 = arith.addf %4, %5 : vector<128x128xf32>
    %cst_5 = arith.constant 0.000000e+00 : f32
    %7 = vector.broadcast %cst_5 : f32 to vector<128x128xf32>
    %8 = arith.maximumf %6, %7 : vector<128x128xf32>
    %c0_6 = arith.constant 0 : index
    %c0_7 = arith.constant 0 : index
    %9 = vector.load %arg4[%c0_6, %c0_7] : memref<128x128xbf16, #tpu.memory_space<vmem>>, vector<128x128xbf16>
    %c0_8 = arith.constant 0 : index
    %c0_9 = arith.constant 0 : index
    %10 = vector.load %arg5[%c0_8, %c0_9] : memref<1x128xf32, #tpu.memory_space<vmem>>, vector<1x128xf32>
    %11 = arith.truncf %8 : vector<128x128xf32> to vector<128x128xbf16>
    %cst_10 = arith.constant dense<0.000000e+00> : vector<128x128xf32>
    %12 = tpu.matmul %11, %9, %cst_10 {dimension_numbers = #tpu.dot_dimension_numbers<[1], [0], [0], [1], [0, 0, 1, 1], [], []>} : vector<128x128xbf16>, vector<128x128xbf16>, vector<128x128xf32> -> vector<128x128xf32>
    %13 = vector.broadcast %10 : vector<1x128xf32> to vector<128x128xf32>
    %14 = arith.addf %12, %13 : vector<128x128xf32>
    %cst_11 = arith.constant 0.000000e+00 : f32
    %15 = vector.broadcast %cst_11 : f32 to vector<128x128xf32>
    %16 = arith.maximumf %14, %15 : vector<128x128xf32>
    %c0_12 = arith.constant 0 : index
    %c0_13 = arith.constant 0 : index
    %17 = vector.load %arg6[%c0_12, %c0_13] : memref<128x128xbf16, #tpu.memory_space<vmem>>, vector<128x128xbf16>
    %c0_14 = arith.constant 0 : index
    %c0_15 = arith.constant 0 : index
    %18 = vector.load %arg7[%c0_14, %c0_15] : memref<1x128xf32, #tpu.memory_space<vmem>>, vector<1x128xf32>
    %19 = arith.truncf %16 : vector<128x128xf32> to vector<128x128xbf16>
    %cst_16 = arith.constant dense<0.000000e+00> : vector<128x128xf32>
    %20 = tpu.matmul %19, %17, %cst_16 {dimension_numbers = #tpu.dot_dimension_numbers<[1], [0], [0], [1], [0, 0, 1, 1], [], []>} : vector<128x128xbf16>, vector<128x128xbf16>, vector<128x128xf32> -> vector<128x128xf32>
    %21 = vector.broadcast %18 : vector<1x128xf32> to vector<128x128xf32>
    %22 = arith.addf %20, %21 : vector<128x128xf32>
    %c0_17 = arith.constant 0 : index
    %c0_18 = arith.constant 0 : index
    %23 = vector.load %arg8[%c0_17, %c0_18] : memref<128x128xf32, #tpu.memory_space<vmem>>, vector<128x128xf32>
    tpu.vector_store %arg8[%c0_17, %c0_18], %22 {strides = array<i32>} : memref<128x128xf32, #tpu.memory_space<vmem>>, vector<128x128xf32>,
    return
  }
  func.func @transform_0(%arg0: i32) -> (i32, i32) {
    %c0_i32 = arith.constant 0 : i32
    %c0_i32_0 = arith.constant 0 : i32
    return %arg0, %c0_i32 : i32, i32
  }
  func.func @transform_1(%arg0: i32) -> (i32, i32) {
    %c0_i32 = arith.constant 0 : i32
    %c0_i32_0 = arith.constant 0 : i32
    %c0_i32_1 = arith.constant 0 : i32
    return %c0_i32, %c0_i32_0 : i32, i32
  }
  func.func @transform_2(%arg0: i32) -> (i32, i32) {
    %c0_i32 = arith.constant 0 : i32
    %c0_i32_0 = arith.constant 0 : i32
    %c0_i32_1 = arith.constant 0 : i32
    return %c0_i32, %c0_i32_0 : i32, i32
  }
  func.func @transform_3(%arg0: i32) -> (i32, i32) {
    %c0_i32 = arith.constant 0 : i32
    %c0_i32_0 = arith.constant 0 : i32
    %c0_i32_1 = arith.constant 0 : i32
    return %c0_i32, %c0_i32_0 : i32, i32
  }
  func.func @transform_4(%arg0: i32) -> (i32, i32) {
    %c0_i32 = arith.constant 0 : i32
    %c0_i32_0 = arith.constant 0 : i32
    %c0_i32_1 = arith.constant 0 : i32
    return %c0_i32, %c0_i32_0 : i32, i32
  }
  func.func @transform_5(%arg0: i32) -> (i32, i32) {
    %c0_i32 = arith.constant 0 : i32
    %c0_i32_0 = arith.constant 0 : i32
    %c0_i32_1 = arith.constant 0 : i32
    return %c0_i32, %c0_i32_0 : i32, i32
  }
  func.func @transform_6(%arg0: i32) -> (i32, i32) {
    %c0_i32 = arith.constant 0 : i32
    %c0_i32_0 = arith.constant 0 : i32
    %c0_i32_1 = arith.constant 0 : i32
    return %c0_i32, %c0_i32_0 : i32, i32
  }
  func.func @transform_7(%arg0: i32) -> (i32, i32) {
    %c0_i32 = arith.constant 0 : i32
    %c0_i32_0 = arith.constant 0 : i32
    return %arg0, %c0_i32 : i32, i32
  }
}

</mosaic_0001>

<bundles_post_ra>
// kernel: ncde_func_forward.1
= control target key start
LH: loop header
LB: loop body
LE: loop exit
PB: predicated region body
PF: predicated region fallthrough
CT: control target
= control target key end

     0   :  { %12 = vsyncpa [#allocation3], 0  ;;  %s2212_s0 = inlined_call_operand.hbm [shape: f32[256,128], index: 0, kind: input, shape index: {}]   ;;  %s2213_s1 = inlined_call_operand.hbm [shape: bf16[128,128], index: 1, kind: input, shape index: {}]   ;;  %s2214_s2 = inlined_call_operand.hbm [shape: f32[1,128], index: 2, kind: input, shape index: {}]   ;;  %s2215_s3 = inlined_call_operand.hbm [shape: bf16[128,128], index: 3, kind: input, shape index: {}]   ;;  %s2216_s4 = inlined_call_operand.hbm [shape: f32[1,128], index: 4, kind: input, shape index: {}]   ;;  %s2217_s5 = inlined_call_operand.hbm [shape: bf16[128,128], index: 5, kind: input, shape index: {}]   ;;  %s2218_s6 = inlined_call_operand.hbm [shape: f32[1,128], index: 6, kind: input, shape index: {}]   ;;  %s2219_s7 = inlined_call_operand.hbm [shape: f32[256,128], index: 7, kind: output, shape index: {}]  }
   0x1   :  { %14 = vsyncpa [#allocation3 + $0x1], 0 }
   0x2   :  { %15 = vsyncpa [#allocation6], 0 }
   0x3   :  { %16 = vsyncpa [#allocation9], 0 }
   0x4   :  { %17 = vsyncpa [#allocation12], 0 }
   0x5   :  { %18 = vsyncpa [#allocation4], 0 }
   0x6   :  { %20 = vsyncpa [#allocation4 + $0x1], 0  ;;  %s1801_s24 = smov 0   ;;  %s1803_s25 = smov 0  }
   0x7   :  { %s1805_s26 = smov 0   ;;  %s1807_s27 = smov 0  }
   0x8 LB: > { %s1747_s28 = smov [#allocation5]   ;;  %s1822_s30 = sadd.s32 4294967295, %s1745_s27   ;;  %s1745_s27 = sphi %s1807_s27, %s2245_s27   ;;  %s1741_s26 = sphi %s1805_s26, %s2244_s26   ;;  %s1737_s25 = sphi %s1803_s25, %s2243_s25   ;;  %s1733_s24 = sphi %s1801_s24, %s2242_s24  }
   0x9   : > { %s221_s29 = sshll.u32 %s1747_s28, 4  ;;  %p1118_p0 = scmp.ge.s32.totalorder %s1745_s27, 1  ;;  %s1827_s29 = int_to_ptr.vmem [resolvable:$true] %s221_s29 }
   0xa   : > { %p2220_p1 = scmp.eq.s32.totalorder %s1822_s30, 0  ;;  %p209_p2 = scmp.lt.s32.totalorder %s1745_s27, 3 }
   0xb   : > { %s1748_s9 = smov [#allocation8]   ;;  %s1749_s12 = smov [#allocation11]  }
   0xc   : > { %p1829_p3 = pnand %p1118_p0, %p209_p2  ;;  %s245_s10 = sshll.u32 %s1748_s9, 4  ;;  %s1842_s10 = int_to_ptr.vmem [resolvable:$true] %s245_s10 }
   0xd   : > { %s269_s13 = sshll.u32 %s1749_s12, 4  ;;  %s1469_s16 = scalar_lea.hbm %s2213_s1, 1024  ;;  %s1844_s13 = int_to_ptr.vmem [resolvable:$true] %s269_s13 }
   0xe   : > { %s2223_s8 = scalar_select %p1829_p3, 1, 0 }
   0xf   : > { %p1360_p5 = pneg %p1829_p3  ;;  %p1470_p7 = scmp.ne.s32.totalorder %s2213_s1, %s1469_s16 }
  0x10   : > { %p1476_p11 = scmp.lt.u32.totalorder %s1469_s16, %s2213_s1 }
  0x11   : > { %p1838_p6 = pnand %p1360_p5, %p2220_p1 }
  0x13   : > { %p1854_p8 = pneg %p1838_p6 }
  0x15   : > { %p1472_p9 = pnand %p1854_p8, %p1470_p7 }
  0x17   : > { %p1473_p10 = pneg %p1472_p9 }
  0x19   : > { %p1478_p12 = pnand %p1476_p11, %p1473_p10 }
  0x1b   : > { %1481 = shalt.err (!%p1478_p12)
}
  0x1c   : > { %s1482_s22 = scalar_lea.vmem %s1827_s29, 1024  ;;  %p1490_p5 = scmp.lt.s32.totalorder %s1827_s29, %s1827_s29 }
  0x1d   : > { %p1483_p13 = scmp.ne.s32.totalorder %s1827_s29, %s1482_s22  ;;  %p1491_p4 = scmp.lt.s32.totalorder %s1482_s22, %s1482_s22 }
  0x1f   : > { %p1485_p0 = pnand %p1483_p13, %p1854_p8  ;;  %p1492_p7 = por %p1491_p4, %p1490_p5 }
  0x21   : > { %p1486_p2 = pneg %p1485_p0 }
  0x23   : > { %p1493_p9 = pnand %p1492_p7, %p1486_p2 }
  0x25   : > { %1496 = shalt.err (!%p1493_p9)
}
  0x26   : > { %s1750_s23 = smov 64   ;;  %s1751_s28 = smov 4  }
  0x27   : > { %1363 = dma.hbm_to_vmem [thread:$0]  (!%p1838_p6), %s2213_s1, 1024, %s1827_s29, [#allocation6], %s1750_s23, %s1750_s23, %s1751_s28  }
  0x28   : > { %s1497_s16 = scalar_lea.hbm %s2215_s3, 1024 }
  0x29   : > { %p1498_p4 = scmp.ne.s32.totalorder %s2215_s3, %s1497_s16  ;;  %p1504_p12 = scmp.lt.u32.totalorder %s1497_s16, %s2215_s3 }
  0x2b   : > { %p1500_p10 = pnand %p1498_p4, %p1854_p8 }
  0x2d   : > { %p1501_p11 = pneg %p1500_p10 }
  0x2f   : > { %p1506_p13 = pnand %p1504_p12, %p1501_p11 }
  0x31   : > { %1509 = shalt.err (!%p1506_p13)
}
  0x32   : > { %s1510_s29 = scalar_lea.vmem %s1842_s10, 1024  ;;  %p1518_p7 = scmp.lt.s32.totalorder %s1842_s10, %s1842_s10 }
  0x33   : > { %p1511_p0 = scmp.ne.s32.totalorder %s1842_s10, %s1510_s29  ;;  %p1519_p9 = scmp.lt.s32.totalorder %s1510_s29, %s1510_s29 }
  0x35   : > { %p1513_p2 = pnand %p1511_p0, %p1854_p8  ;;  %p1520_p4 = por %p1519_p9, %p1518_p7 }
  0x37   : > { %p1514_p5 = pneg %p1513_p2 }
  0x39   : > { %p1521_p10 = pnand %p1520_p4, %p1514_p5 }
  0x3b   : > { %1524 = shalt.err (!%p1521_p10)
}
  0x3c   : > { %1369 = dma.hbm_to_vmem [thread:$0]  (!%p1838_p6), %s2215_s3, 1024, %s1842_s10, [#allocation9], %s1750_s23, %s1750_s23, %s1751_s28  }
  0x3d   : > { %s1525_s15 = scalar_lea.hbm %s2217_s5, 1024 }
  0x3e   : > { %p1526_p11 = scmp.ne.s32.totalorder %s2217_s5, %s1525_s15  ;;  %p1532_p0 = scmp.lt.u32.totalorder %s1525_s15, %s2217_s5 }
  0x40   : > { %p1528_p12 = pnand %p1526_p11, %p1854_p8 }
  0x42   : > { %p1529_p13 = pneg %p1528_p12 }
  0x44   : > { %p1534_p2 = pnand %p1532_p0, %p1529_p13 }
  0x46   : > { %1537 = shalt.err (!%p1534_p2)
}
  0x47   : > { %s1538_s10 = scalar_lea.vmem %s1844_s13, 1024  ;;  %p1546_p4 = scmp.lt.s32.totalorder %s1844_s13, %s1844_s13 }
  0x48   : > { %p1539_p5 = scmp.ne.s32.totalorder %s1844_s13, %s1538_s10  ;;  %p1547_p10 = scmp.lt.s32.totalorder %s1538_s10, %s1538_s10 }
  0x4a   : > { %p1541_p7 = pnand %p1539_p5, %p1854_p8  ;;  %p1548_p11 = por %p1547_p10, %p1546_p4 }
  0x4c   : > { %p1542_p9 = pneg %p1541_p7 }
  0x4e   : > { %p1549_p12 = pnand %p1548_p11, %p1542_p9 }
  0x50   : > { %1552 = shalt.err (!%p1549_p12)
}
  0x51   : > { %1375 = dma.hbm_to_vmem [thread:$0]  (!%p1838_p6), %s2217_s5, 1024, %s1844_s13, [#allocation12], %s1750_s23, %s1750_s23, %s1751_s28  }
  0x52   : > { %s1752_s22 = smov [#allocation7]   ;;  %s1753_s12 = smov [#allocation10]  }
  0x53   : > { %s235_s9 = sshll.u32 %s1752_s22, 4  ;;  %s259_s14 = sshll.u32 %s1753_s12, 4  ;;  %s236_s9 = int_to_ptr.vmem [resolvable:$true] %s235_s9  ;;  %s260_s14 = int_to_ptr.vmem [resolvable:$true] %s259_s14 }
  0x54   : > { %s1553_s17 = scalar_lea.hbm %s2214_s2, 16 }
  0x55   : > { %p1554_p13 = scmp.ne.s32.totalorder %s2214_s2, %s1553_s17  ;;  %p1560_p5 = scmp.lt.u32.totalorder %s1553_s17, %s2214_s2 }
  0x57   : > { %p1556_p0 = pnand %p1554_p13, %p1854_p8 }
  0x59   : > { %p1557_p2 = pneg %p1556_p0 }
  0x5b   : > { %p1562_p7 = pnand %p1560_p5, %p1557_p2 }
  0x5d   : > { %1565 = shalt.err (!%p1562_p7)
}
  0x5e   : > { %s1566_s13 = scalar_lea.vmem %s236_s9, 16  ;;  %s1573_s23 = scalar_lea.vmem %s236_s9, 32 }
  0x5f   : > { %p1567_p9 = scmp.ne.s32.totalorder %s236_s9, %s1566_s13  ;;  %p1574_p11 = scmp.lt.s32.totalorder %s236_s9, %s236_s9 }
  0x60   : > { %p1575_p12 = scmp.lt.s32.totalorder %s1573_s23, %s1566_s13 }
  0x61   : > { %p1569_p4 = pnand %p1567_p9, %p1854_p8 }
  0x62   : > { %p1576_p1 = por %p1575_p12, %p1574_p11 }
  0x63   : > { %p1570_p10 = pneg %p1569_p4 }
  0x65   : > { %p1577_p3 = pnand %p1576_p1, %p1570_p10 }
  0x67   : > { %1580 = shalt.err (!%p1577_p3)
}
  0x68   : > { %1366 = dma.hbm_to_vmem [thread:$0]  (!%p1838_p6), %s2214_s2, 16, %s236_s9, [#allocation6]  }
  0x69   : > { %s1581_s15 = scalar_lea.hbm %s2216_s4, 16 }
  0x6a   : > { %p1582_p13 = scmp.ne.s32.totalorder %s2216_s4, %s1581_s15  ;;  %p1588_p3 = scmp.lt.u32.totalorder %s1581_s15, %s2216_s4 }
  0x6c   : > { %p1584_p0 = pnand %p1582_p13, %p1854_p8 }
  0x6e   : > { %p1585_p1 = pneg %p1584_p0 }
  0x70   : > { %p1590_p2 = pnand %p1588_p3, %p1585_p1 }
  0x72   : > { %1593 = shalt.err (!%p1590_p2)
}
  0x73   : > { %s1594_s10 = scalar_lea.vmem %s260_s14, 16  ;;  %s1601_s9 = scalar_lea.vmem %s260_s14, 32 }
  0x74   : > { %p1595_p5 = scmp.ne.s32.totalorder %s260_s14, %s1594_s10  ;;  %p1602_p4 = scmp.lt.s32.totalorder %s260_s14, %s260_s14 }
  0x75   : > { %p1603_p10 = scmp.lt.s32.totalorder %s1601_s9, %s1594_s10 }
  0x76   : > { %p1597_p7 = pnand %p1595_p5, %p1854_p8 }
  0x77   : > { %p1604_p11 = por %p1603_p10, %p1602_p4 }
  0x78   : > { %p1598_p9 = pneg %p1597_p7 }
  0x7a   : > { %p1605_p12 = pnand %p1604_p11, %p1598_p9 }
  0x7c   : > { %1608 = shalt.err (!%p1605_p12)
}
  0x7d   : > { %1372 = dma.hbm_to_vmem [thread:$0]  (!%p1838_p6), %s2216_s4, 16, %s260_s14, [#allocation9]  }
  0x7e   : > { %s1754_s23 = smov [#allocation13]   ;;  %s1609_s12 = scalar_lea.hbm %s2218_s6, 16 }
  0x7f   : > { %s283_s28 = sshll.u32 %s1754_s23, 4  ;;  %p1610_p13 = scmp.ne.s32.totalorder %s2218_s6, %s1609_s12  ;;  %s284_s28 = int_to_ptr.vmem [resolvable:$true] %s283_s28 }
  0x80   : > { %p1616_p3 = scmp.lt.u32.totalorder %s1609_s12, %s2218_s6 }
  0x81   : > { %p1612_p0 = pnand %p1610_p13, %p1854_p8 }
  0x83   : > { %p1613_p1 = pneg %p1612_p0 }
  0x85   : > { %p1618_p2 = pnand %p1616_p3, %p1613_p1 }
  0x87   : > { %1621 = shalt.err (!%p1618_p2)
}
  0x88   : > { %s1622_s14 = scalar_lea.vmem %s284_s28, 16  ;;  %s1629_s20 = scalar_lea.vmem %s284_s28, 32 }
  0x89   : > { %p1623_p5 = scmp.ne.s32.totalorder %s284_s28, %s1622_s14  ;;  %p1630_p4 = scmp.lt.s32.totalorder %s284_s28, %s284_s28 }
  0x8a   : > { %p1631_p10 = scmp.lt.s32.totalorder %s1629_s20, %s1622_s14 }
  0x8b   : > { %p1625_p7 = pnand %p1623_p5, %p1854_p8 }
  0x8c   : > { %p1632_p11 = por %p1631_p10, %p1630_p4 }
  0x8d   : > { %p1626_p9 = pneg %p1625_p7 }
  0x8f   : > { %p1633_p12 = pnand %p1632_p11, %p1626_p9 }
  0x91   : > { %1636 = shalt.err (!%p1633_p12)
}
  0x92   : > { %1378 = dma.hbm_to_vmem [thread:$0]  (!%p1838_p6), %s2218_s6, 16, %s284_s28, [#allocation12]  }
  0x93   : > { %s1117_s19 = sadd.s32 4294967294, %s1745_s27   ;;  %s1986_s11 = sadd.s32 1, %s1745_s27  }
  0x94   : > { %s30_s21 = ssub.s32 %s1745_s27, %s1986_s11  ;;  %s33_s13 = sadd.s32 1, %s1741_s26 }
  0x95   : > { %p31_p8 = scmp.eq.s32.totalorder %s30_s21, 0  ;;  %p40_p13 = scmp.ne.s32.totalorder %s1741_s26, %s1737_s25 }
  0x96   : > { %p41_p0 = scmp.eq.s32.totalorder %s1745_s27, 0  ;;  %p46_p1 = scmp.ne.s32.totalorder %s1737_s25, %s1733_s24 }
  0x97   : > { %s1997_s23 = scalar_select %p31_p8, %s1741_s26, %s33_s13  }
  0x98   : > { %p1999_p3 = por %p41_p0, %p40_p13  ;;  %p2227_p2 = scmp.eq.s32.totalorder %s1822_s30, 0 }
  0x99   : > { %p196_p5 = scmp.eq.s32.totalorder %s1822_s30, 1  ;;  %p202_p7 = scmp.eq.s32.totalorder %s1117_s19, 1 }
  0x9a   : > { %p2005_p6 = por %p2227_p2, %p46_p1  ;;  %p1393_p9 = scmp.lt.s32.totalorder %s1745_s27, 2 }
  0x9b   : > { %s294_s22 = sand.u32 1, %s1741_s26   ;;  %p2012_p4 = por %p196_p5, %p40_p13 }
  0x9c   : > { %p2016_p10 = por %p202_p7, %p46_p1  ;;  %s1126_s16 = sshll.u32 %s294_s22, 7 }
  0x9d   : > { %s2229_s12 = scalar_select %p2012_p4, 1, 0 }
  0x9e   : > { %s2230_s15 = scalar_select %p2016_p10, 1, 0 }
  0x9f   : > { %s1170_s17 = sshll.u32 %s1745_s27, 11  ;;  %s298_s10 = scalar_lea.vmem [#allocation2], %s1126_s16 }
  0xa0   : > { %s2024_s20 = scalar_lea.hbm %s2212_s0, %s1170_s17  ;;  %s305_s9 = sshll.u32 %s298_s10, 4  ;;  %s2026_s9 = int_to_ptr.vmem [resolvable:$true] %s305_s9 }
  0xa1   : > { %p2030_p11 = pnand %p1393_p9, %p1999_p3  ;;  %s2034_s21 = scalar_lea.sflag [#allocation3], %s294_s22 }
  0xa2   : > { %s1637_s13 = scalar_lea.hbm %s2024_s20, 2048  ;;  %s1642_s29 = scalar_lea.hbm %s2212_s0, 4096 }
  0xa3   : > { %p1638_p12 = scmp.ne.s32.totalorder %s2024_s20, %s1637_s13  ;;  %p1639_p8 = pneg %p2030_p11 }
  0xa4   : > { %p1643_p1 = scmp.lt.u32.totalorder %s2024_s20, %s2212_s0  ;;  %p1644_p3 = scmp.lt.u32.totalorder %s1642_s29, %s1637_s13 }
  0xa5   : > { %p1640_p13 = pnand %p1639_p8, %p1638_p12  ;;  %p1646_p5 = scmp.lt.u32.totalorder %s1637_s13, %s2024_s20 }
  0xa6   : > { %p1645_p2 = por %p1644_p3, %p1643_p1 }
  0xa7   : > { %p1641_p0 = pneg %p1640_p13 }
  0xa8   : > { %p1647_p7 = por %p1646_p5, %p1645_p2 }
  0xaa   : > { %p1648_p9 = pnand %p1647_p7, %p1641_p0 }
  0xac   : > { %1651 = shalt.err (!%p1648_p9)
}
  0xad   : > { %s1652_s22 = scalar_lea.vmem %s2026_s9, 2048  ;;  %s1755_s10 = smov [#allocation2]  }
  0xae   : > { %p1653_p12 = scmp.ne.s32.totalorder %s2026_s9, %s1652_s22  ;;  %s1657_s16 = sshll.u32 %s1755_s10, 4  ;;  %s1658_s16 = int_to_ptr.vmem [resolvable:$false] %s1657_s16 }
  0xaf   : > { %s1659_s17 = scalar_lea.vmem %s1658_s16, 4096  ;;  %p1660_p4 = scmp.lt.s32.totalorder %s2026_s9, %s1658_s16 }
  0xb0   : > { %p1655_p13 = pnand %p1653_p12, %p1639_p8  ;;  %p1661_p1 = scmp.lt.s32.totalorder %s1659_s17, %s1652_s22 }
  0xb2   : > { %p1656_p10 = pneg %p1655_p13  ;;  %p1662_p3 = por %p1661_p1, %p1660_p4 }
  0xb4   : > { %p1663_p2 = pnand %p1662_p3, %p1656_p10 }
  0xb6   : > { %1666 = shalt.err (!%p1663_p2)
}
  0xb7   : > { %s1756_s13 = smov 128   ;;  %s1757_s29 = smov 8  }
  0xb8   : > { %1382 = dma.hbm_to_vmem [thread:$0]  (!%p2030_p11), %s2024_s20, 2048, %s2026_s9, %s2034_s21, %s1756_s13, %s1756_s13, %s1757_s29  }
  0xb9   : > { %p2232_p8 = scmp.ne.s32.totalorder %s2223_s8, 0 }
  0xba   : > { %s2065_s18 = sand.u32 (!%p2232_p8), 1, %s1737_s25  }
  0xbb   : > { %317 = sbr.rel (%p2232_p8) target bundleno = 938 (0x3aa), region = 48  ;;  %s1130_s14 = sshll.u32 (!%p2232_p8), %s2065_s18, 7 }
  0xbc   : > { %s320_s22 = scalar_lea.sflag (!%p2232_p8), [#allocation3], %s2065_s18  ;;  %s2071_s10 = scalar_lea.vmem (!%p2232_p8), [#allocation2], %s1130_s14 }
  0xc2   : > { %1712 = dma.done.wait (%p2005_p6), %s320_s22, 2048  }
  0xc3   : > { %1714 = vsyncadd (%p2005_p6), %s320_s22, 4294965248  ;;  %p2233_p4 = scmp.eq.s32.totalorder %s1822_s30, 0 }
  0xc5   : > { %1716 = dma.done.wait (%p2233_p4), [#allocation6], 1040   ;;  %p2234_p10 = pmov %p2233_p4 }
  0xc6   : > { %p2235_p11 = pmov %p2233_p4 }
  0xc7   : > { %1718 = vsyncadd (%p2234_p10), [#allocation6], 4294966256 }
  0xc8   : > { %1720 = dma.done.wait (%p2235_p11), [#allocation9], 1040   ;;  %p2236_p0 = pmov %p2233_p4 }
  0xca   : > { %1722 = vsyncadd (%p2236_p0), [#allocation9], 4294966256  ;;  %p2237_p5 = pmov %p2236_p0 }
  0xcb   : > { %p2238_p7 = pmov %p2236_p0 }
  0xcc   : > { %1724 = dma.done.wait (%p2237_p5), [#allocation12], 1040  }
  0xcd   : > { %1726 = vsyncadd (%p2238_p7), [#allocation12], 4294966256  ;;  %v1445_v0 = vld [vmem:[#allocation5] sm:$0xff]   ;;  %v1446_v1 = vld [vmem:[#allocation5 + $0x8] sm:$0xff]   ;;  %s2143_s8 = scalar_lea.vmem [#allocation14], %s1130_s14  ;;  %s1171_s28 = sshll.u32 %s1822_s30, 11 }
  0xce   : > { %1220 = vmatprep.subr.bf16.mxu0 %v1445_v0  ;;  %v1447_v2 = vld [vmem:[#allocation5 + $0x10] sm:$0xff]   ;;  %v1448_v3 = vld [vmem:[#allocation5 + $0x18] sm:$0xff]   ;;  %v381_v4 = vld [vmem:[%s2071_s10] sm:$0xff]  ;;  %s987_s20 = sshll.u32 %s2143_s8, 4  ;;  %s2163_s21 = scalar_lea.hbm %s2219_s7, %s1171_s28  ;;  %s2165_s20 = int_to_ptr.vmem [resolvable:$true] %s987_s20 }
  0xcf   : > { %1221 = vmatpush3.bf16.msra.mxu0 %v1445_v0  ;;  %v382_v5 = vld [vmem:[%s2071_s10 + $0x8] sm:$0xff]  ;;  %v1449_v7 = vld [vmem:[#allocation5 + $0x20] sm:$0xff]   ;;  %v1455_v11 = vld [vmem:[#allocation8 + $0x10] sm:$0xff]   ;;  %s974_s30 = scalar_lea.sflag [#allocation4], %s2065_s18  ;;  %s1667_s16 = scalar_lea.vmem %s2165_s20, 2048 }
  0xd0   : > { %1222 = vmatprep.subr.bf16.mxu0 %v1446_v1  ;;  %v414_v6 = vpack.c.bf16 %v382_v5, %v381_v4  ;;  %v1453_v8 = vld [vmem:[#allocation8] sm:$0xff]   ;;  %v1454_v9 = vld [vmem:[#allocation8 + $0x8] sm:$0xff]   ;;  %v1456_v13 = vld [vmem:[#allocation8 + $0x18] sm:$0xff]   ;;  %p1668_p6 = scmp.ne.s32.totalorder %s2165_s20, %s1667_s16  ;;  %p2239_p9 = scmp.ne.s32.totalorder %s2229_s12, 0 }
  0xd1   : > { %v1450_v10 = vld [vmem:[#allocation5 + $0x28] sm:$0xff]   ;;  %1252 = vmatprep.subr.bf16.mxu1 %v1453_v8  ;;  %v1451_v12 = vld [vmem:[#allocation5 + $0x30] sm:$0xff]   ;;  %v1452_v14 = vld [vmem:[#allocation5 + $0x38] sm:$0xff]   ;;  %s1758_s17 = smov [#allocation14]  }
  0xd2   : > { %1236 = vmatprep.mubr.bf16.mxu0 %v414_v6  ;;  %1253 = vmatpush3.bf16.msra.mxu1 %v1453_v8  ;;  %v1457_v15 = vld [vmem:[#allocation8 + $0x20] sm:$0xff]   ;;  %v383_v16 = vld [vmem:[%s2071_s10 + $0x10] sm:$0xff]  ;;  %v384_v17 = vld [vmem:[%s2071_s10 + $0x18] sm:$0xff]  ;;  %p1669_p12 = pnand %p1668_p6, %p2239_p9  ;;  %s1671_s13 = sshll.u32 %s1758_s17, 4  ;;  %s1672_s13 = int_to_ptr.vmem [resolvable:$false] %s1671_s13 }
  0xd3   : > { %1223 = vmatpush3.bf16.msra.mxu0 %v1446_v1  ;;  %1254 = vmatprep.subr.bf16.mxu1 %v1454_v9  ;;  %v385_v18 = vld [vmem:[%s2071_s10 + $0x20] sm:$0xff]  ;;  %v386_v19 = vld [vmem:[%s2071_s10 + $0x28] sm:$0xff]  ;;  %v415_v20 = vpack.c.bf16 %v384_v17, %v383_v16  ;;  %v387_v23 = vld [vmem:[%s2071_s10 + $0x30] sm:$0xff]  ;;  %s1673_s29 = scalar_lea.vmem %s1672_s13, 4096  ;;  %p1674_p1 = scmp.lt.s32.totalorder %s2165_s20, %s1672_s13 }
  0xd4   : > { %1224 = vmatprep.subr.bf16.mxu0 %v1447_v2  ;;  %v1458_v21 = vld [vmem:[#allocation8 + $0x28] sm:$0xff]   ;;  %v416_v22 = vpack.c.bf16 %v386_v19, %v385_v18  ;;  %v388_v24 = vld [vmem:[%s2071_s10 + $0x38] sm:$0xff]  ;;  %v389_v25 = vld [vmem:[%s2071_s10 + $0x40] sm:$0xff]  ;;  %p1670_p13 = pneg %p1669_p12  ;;  %p1675_p3 = scmp.lt.s32.totalorder %s1673_s29, %s1667_s16 }
  0xd5   : > { %v390_v26 = vld [vmem:[%s2071_s10 + $0x48] sm:$0xff]  ;;  %v417_v27 = vpack.c.bf16 %v388_v24, %v387_v23  ;;  %v391_v29 = vld [vmem:[%s2071_s10 + $0x50] sm:$0xff]  ;;  %v392_v30 = vld [vmem:[%s2071_s10 + $0x58] sm:$0xff] }
  0xd6   : > { %1255 = vmatpush3.bf16.msra.mxu1 %v1454_v9  ;;  %v418_v28 = vpack.c.bf16 %v390_v26, %v389_v25  ;;  %v393_v31 = vld [vmem:[%s2071_s10 + $0x60] sm:$0xff]  ;;  %v394_v32 = vld [vmem:[%s2071_s10 + $0x68] sm:$0xff]  ;;  %v419_v33 = vpack.c.bf16 %v392_v30, %v391_v29  ;;  %v395_v35 = vld [vmem:[%s2071_s10 + $0x70] sm:$0xff]  ;;  %p1676_p2 = por %p1675_p3, %p1674_p1 }
  0xd7   : > { %1225 = vmatpush3.bf16.msra.mxu0 %v1447_v2  ;;  %1256 = vmatprep.subr.bf16.mxu1 %v1455_v11  ;;  %v420_v34 = vpack.c.bf16 %v394_v32, %v393_v31  ;;  %v396_v36 = vld [vmem:[%s2071_s10 + $0x78] sm:$0xff]  ;;  %v1461_v40 = vld [vmem:[#allocation11] sm:$0xff]   ;;  %v1462_v41 = vld [vmem:[#allocation11 + $0x8] sm:$0xff]  }
  0xd8   : > { %1226 = vmatprep.subr.bf16.mxu0 %v1448_v3  ;;  %v421_v37 = vpack.c.bf16 %v396_v36, %v395_v35  ;;  %v1459_v38 = vld [vmem:[#allocation8 + $0x30] sm:$0xff]   ;;  %v1460_v39 = vld [vmem:[#allocation8 + $0x38] sm:$0xff]   ;;  %v2108_v44 = vld [vmem:[#allocation11 + $0x20] sm:$0xff]   ;;  %p1677_p8 = pnand %p1676_p2, %p1670_p13 }
  0xd9   : > { %v1463_v42 = vld [vmem:[#allocation11 + $0x10] sm:$0xff]   ;;  %v2105_v43 = vld [vmem:[#allocation11 + $0x18] sm:$0xff]   ;;  %v2112_v45 = vld [vmem:[#allocation11 + $0x28] sm:$0xff]  }
  0xda   : > { %1257 = vmatpush3.bf16.msra.mxu1 %v1455_v11  ;;  %v2117_v46 = vld [vmem:[#allocation7] ss:$0 sm:$0xff] }
  0xdb   : > { %1227 = vmatpush3.bf16.msra.mxu0 %v1448_v3  ;;  %1258 = vmatprep.subr.bf16.mxu1 %v1456_v13 }
  0xdc   : > { %1228 = vmatprep.subr.bf16.mxu0 %v1449_v7 }
  0xde   : > { %1259 = vmatpush3.bf16.msra.mxu1 %v1456_v13 }
  0xdf   : > { %1229 = vmatpush3.bf16.msra.mxu0 %v1449_v7  ;;  %1260 = vmatprep.subr.bf16.mxu1 %v1457_v15 }
  0xe0   : > { %1230 = vmatprep.subr.bf16.mxu0 %v1450_v10 }
  0xe2   : > { %1261 = vmatpush3.bf16.msra.mxu1 %v1457_v15 }
  0xe3   : > { %1231 = vmatpush3.bf16.msra.mxu0 %v1450_v10  ;;  %1262 = vmatprep.subr.bf16.mxu1 %v1458_v21 }
  0xe4   : > { %1232 = vmatprep.subr.bf16.mxu0 %v1451_v12 }
  0xe6   : > { %1263 = vmatpush3.bf16.msra.mxu1 %v1458_v21 }
  0xe7   : > { %1233 = vmatpush3.bf16.msra.mxu0 %v1451_v12  ;;  %1264 = vmatprep.subr.bf16.mxu1 %v1459_v38 }
  0xe8   : > { %1234 = vmatprep.subr.bf16.mxu0 %v1452_v14 }
  0xea   : > { %1265 = vmatpush3.bf16.msra.mxu1 %v1459_v38 }
  0xeb   : > { %1235 = vmatpush3.bf16.msra.mxu0 %v1452_v14  ;;  %1266 = vmatprep.subr.bf16.mxu1 %v1460_v39 }
  0xec   : > { %1284 = vmatprep.subr.bf16.mxu0 %v1461_v40 }
  0xee   : > { %1237 = vmatmul.mubr.bf16.vlgmr.msra.gmra.mrb[0].mxu0 %v415_v20  ;;  %1267 = vmatpush3.bf16.msra.mxu1 %v1460_v39  ;;  %v1467_v39 = vld [vmem:[#allocation11 + $0x30] sm:$0xff]  }
  0xef   : > { %1240 = vmatprep.mubr.bf16.mxu0 %v416_v22  ;;  %1316 = vmatprep.subr.bf16.mxu1 %v1461_v40 }
  0xf0   : > { %1285 = vmatpush3.bf16.msra.mxu0 %v1461_v40 }
  0xf1   : > { %1286 = vmatprep.subr.bf16.mxu0 %v1462_v41 }
  0xf4   : > { %1287 = vmatpush3.bf16.msra.mxu0 %v1462_v41 }
  0xf5   : > { %1288 = vmatprep.subr.bf16.mxu0 %v1463_v42 }
  0xf6   : > { %1241 = vmatmul.mubr.bf16.gmra.mrb[4].mxu0 %v417_v27 }
  0xf7   : > { %1244 = vmatprep.mubr.bf16.mxu0 %v418_v28 }
  0xf8   : > { %1289 = vmatpush3.bf16.msra.mxu0 %v1463_v42 }
  0xf9   : > { %1290 = vmatprep.subr.bf16.mxu0 %v2105_v43 }
  0xfc   : > { %1291 = vmatpush3.bf16.msra.mxu0 %v2105_v43 }
  0xfd   : > { %1292 = vmatprep.subr.bf16.mxu0 %v2108_v44 }
  0xfe   : > { %1245 = vmatmul.mubr.bf16.gmra.mrb[8].mxu0 %v419_v33 }
  0xff   : > { %1248 = vmatprep.mubr.bf16.mxu0 %v420_v34 }
 0x100   : > { %1293 = vmatpush3.bf16.msra.mxu0 %v2108_v44 }
 0x101   : > { %1294 = vmatprep.subr.bf16.mxu0 %v2112_v45 }
 0x104   : > { %1295 = vmatpush3.bf16.msra.mxu0 %v2112_v45 }
 0x105   : > { %1296 = vmatprep.subr.bf16.mxu0 %v1467_v39 }
 0x106   : > { %1249 = vmatmul.mubr.bf16.gmra.mrb[12].mxu0 %v421_v37 }
 0x108   : > { %1297 = vmatpush3.bf16.msra.mxu0 %v1467_v39 }
 0x1c1   : > { %v1238_v47 = vpop.f32.mrb[0].mxu0 }
 0x1c2   : > { %v519_v48 = vadd.f32 %v1238_v47, %v2117_v46  ;;  %v510_v49 = vpop.f32.mrb[1].mxu0 }
 0x1c3   : > { %v511_v50 = vadd.f32 %v2117_v46, %v510_v49  ;;  %v1239_v51 = vpop.f32.mrb[2].mxu0 }
 0x1c4   : > { %v522_v52 = vadd.f32 %v1239_v51, %v2117_v46  ;;  %v513_v53 = vpop.f32.mrb[3].mxu0  ;;  %v575_v55 = vmax.f32 %v519_v48, 0.0 }
 0x1c5   : > { %v514_v54 = vadd.f32 %v2117_v46, %v513_v53  ;;  %v573_v57 = vmax.f32 %v511_v50, 0.0 }
 0x1c6   : > { %v576_v56 = vmax.f32 %v522_v52, 0.0 }
 0x1c7   : > { %v574_v58 = vmax.f32 %v514_v54, 0.0 }
 0x1c8   : > { %v607_v59 = vpack.c.bf16 %v576_v56, %v575_v55 }
 0x1c9   : > { %v1242_v60 = vpop.f32.mrb[4].mxu0  ;;  %v606_v61 = vpack.c.bf16 %v574_v58, %v573_v57 }
 0x1ca   : > { %v535_v62 = vadd.f32 %v1242_v60, %v2117_v46  ;;  %v526_v63 = vpop.f32.mrb[5].mxu0 }
 0x1cb   : > { %v527_v0 = vadd.f32 %v2117_v46, %v526_v63  ;;  %v1243_v1 = vpop.f32.mrb[6].mxu0  ;;  %1268 = vmatprep.mubr.bf16.mxu1 %v606_v61 }
 0x1cc   : > { %v538_v2 = vadd.f32 %v1243_v1, %v2117_v46  ;;  %v529_v3 = vpop.f32.mrb[7].mxu0  ;;  %1269 = vmatmul.mubr.bf16.vlgmr.msra.gmra.mrb[0].mxu1 %v607_v59  ;;  %v579_v5 = vmax.f32 %v535_v62, 0.0 }
 0x1cd   : > { %v530_v4 = vadd.f32 %v2117_v46, %v529_v3  ;;  %1324 = vmatpush3.bf16.msra.mxu1 %v1461_v40  ;;  %v577_v7 = vmax.f32 %v527_v0, 0.0  ;;  %v1468_v40 = vld [vmem:[#allocation11 + $0x38] sm:$0xff]  }
 0x1ce   : > { %v580_v6 = vmax.f32 %v538_v2, 0.0  ;;  %1317 = vmatprep.subr.bf16.mxu1 %v1462_v41  ;;  %1298 = vmatprep.subr.bf16.mxu0 %v1468_v40 }
 0x1cf   : > { %v578_v8 = vmax.f32 %v530_v4, 0.0  ;;  %1299 = vmatpush3.bf16.msra.mxu0 %v1468_v40 }
 0x1d0   : > { %v609_v9 = vpack.c.bf16 %v580_v6, %v579_v5 }
 0x1d1   : > { %v608_v10 = vpack.c.bf16 %v578_v8, %v577_v7  ;;  %v1246_v11 = vpop.f32.mrb[8].mxu0  ;;  %1325 = vmatpush3.bf16.msra.mxu1 %v1462_v41  ;;  %v1147_v41 = vld [vmem:[#allocation10] ss:$0 sm:$0xff] }
 0x1d2   : > { %v551_v12 = vadd.f32 %v1246_v11, %v2117_v46  ;;  %v542_v13 = vpop.f32.mrb[9].mxu0  ;;  %1318 = vmatprep.subr.bf16.mxu1 %v1463_v42 }
 0x1d3   : > { %v543_v14 = vadd.f32 %v2117_v46, %v542_v13  ;;  %v1247_v15 = vpop.f32.mrb[10].mxu0  ;;  %1272 = vmatprep.mubr.bf16.mxu1 %v608_v10 }
 0x1d4   : > { %v554_v16 = vadd.f32 %v1247_v15, %v2117_v46  ;;  %v545_v17 = vpop.f32.mrb[11].mxu0  ;;  %1273 = vmatmul.mubr.bf16.gmra.mrb[4].mxu1 %v609_v9  ;;  %v583_v19 = vmax.f32 %v551_v12, 0.0 }
 0x1d5   : > { %v546_v18 = vadd.f32 %v2117_v46, %v545_v17  ;;  %1326 = vmatpush3.bf16.msra.mxu1 %v1463_v42  ;;  %v581_v21 = vmax.f32 %v543_v14, 0.0 }
 0x1d6   : > { %v584_v20 = vmax.f32 %v554_v16, 0.0  ;;  %1319 = vmatprep.subr.bf16.mxu1 %v2105_v43 }
 0x1d7   : > { %v582_v22 = vmax.f32 %v546_v18, 0.0 }
 0x1d8   : > { %v611_v23 = vpack.c.bf16 %v584_v20, %v583_v19 }
 0x1d9   : > { %v610_v24 = vpack.c.bf16 %v582_v22, %v581_v21  ;;  %v1250_v25 = vpop.f32.mrb[12].mxu0  ;;  %1327 = vmatpush3.bf16.msra.mxu1 %v2105_v43 }
 0x1da   : > { %v567_v26 = vadd.f32 %v1250_v25, %v2117_v46  ;;  %v558_v27 = vpop.f32.mrb[13].mxu0  ;;  %1320 = vmatprep.subr.bf16.mxu1 %v2108_v44 }
 0x1db   : > { %v559_v28 = vadd.f32 %v2117_v46, %v558_v27  ;;  %v1251_v29 = vpop.f32.mrb[14].mxu0  ;;  %1276 = vmatprep.mubr.bf16.mxu1 %v610_v24 }
 0x1dc   : > { %v570_v30 = vadd.f32 %v1251_v29, %v2117_v46  ;;  %v561_v31 = vpop.f32.mrb[15].mxu0  ;;  %1277 = vmatmul.mubr.bf16.gmra.mrb[8].mxu1 %v611_v23  ;;  %v587_v33 = vmax.f32 %v567_v26, 0.0 }
 0x1dd   : > { %v562_v32 = vadd.f32 %v2117_v46, %v561_v31  ;;  %1328 = vmatpush3.bf16.msra.mxu1 %v2108_v44  ;;  %v585_v35 = vmax.f32 %v559_v28, 0.0 }
 0x1de   : > { %v588_v34 = vmax.f32 %v570_v30, 0.0  ;;  %1321 = vmatprep.subr.bf16.mxu1 %v2112_v45 }
 0x1df   : > { %v586_v36 = vmax.f32 %v562_v32, 0.0 }
 0x1e0   : > { %v613_v37 = vpack.c.bf16 %v588_v34, %v587_v33  ;;  %v1156_v34 = vld [vmem:[#allocation13] ss:$0 sm:$0xff] }
 0x1e1   : > { %v612_v38 = vpack.c.bf16 %v586_v36, %v585_v35  ;;  %1329 = vmatpush3.bf16.msra.mxu1 %v2112_v45 }
 0x1e2   : > { %1322 = vmatprep.subr.bf16.mxu1 %v1467_v39 }
 0x1e3   : > { %1280 = vmatprep.mubr.bf16.mxu1 %v612_v38 }
 0x1e4   : > { %1281 = vmatmul.mubr.bf16.gmra.mrb[12].mxu1 %v613_v37 }
 0x1e5   : > { %1330 = vmatpush3.bf16.msra.mxu1 %v1467_v39 }
 0x1e6   : > { %1323 = vmatprep.subr.bf16.mxu1 %v1468_v40 }
 0x1e9   : > { %1331 = vmatpush3.bf16.msra.mxu1 %v1468_v40 }
 0x29f   : > { %v1270_v42 = vpop.f32.mrb[0].mxu1 }
 0x2a0   : > { %v711_v43 = vadd.f32 %v1270_v42, %v1147_v41  ;;  %v702_v44 = vpop.f32.mrb[1].mxu1 }
 0x2a1   : > { %v703_v46 = vadd.f32 %v1147_v41, %v702_v44  ;;  %v1271_v47 = vpop.f32.mrb[2].mxu1 }
 0x2a2   : > { %v714_v48 = vadd.f32 %v1271_v47, %v1147_v41  ;;  %v705_v45 = vpop.f32.mrb[3].mxu1  ;;  %v767_v50 = vmax.f32 %v711_v43, 0.0 }
 0x2a3   : > { %v706_v49 = vadd.f32 %v1147_v41, %v705_v45  ;;  %v765_v52 = vmax.f32 %v703_v46, 0.0 }
 0x2a4   : > { %v768_v51 = vmax.f32 %v714_v48, 0.0 }
 0x2a5   : > { %v766_v53 = vmax.f32 %v706_v49, 0.0 }
 0x2a6   : > { %v799_v54 = vpack.c.bf16 %v768_v51, %v767_v50 }
 0x2a7   : > { %v798_v55 = vpack.c.bf16 %v766_v53, %v765_v52  ;;  %v1274_v56 = vpop.f32.mrb[4].mxu1 }
 0x2a8   : > { %v727_v57 = vadd.f32 %v1274_v56, %v1147_v41  ;;  %v718_v58 = vpop.f32.mrb[5].mxu1 }
 0x2a9   : > { %v719_v59 = vadd.f32 %v1147_v41, %v718_v58  ;;  %v1275_v60 = vpop.f32.mrb[6].mxu1  ;;  %1300 = vmatprep.mubr.bf16.mxu0 %v798_v55 }
 0x2aa   : > { %v730_v61 = vadd.f32 %v1275_v60, %v1147_v41  ;;  %v721_v62 = vpop.f32.mrb[7].mxu1  ;;  %1301 = vmatmul.mubr.bf16.vlgmr.msra.gmra.mrb[16].mxu0 %v799_v54  ;;  %v771_v0 = vmax.f32 %v727_v57, 0.0 }
 0x2ab   : > { %v722_v63 = vadd.f32 %v1147_v41, %v721_v62  ;;  %v769_v2 = vmax.f32 %v719_v59, 0.0 }
 0x2ac   : > { %v772_v1 = vmax.f32 %v730_v61, 0.0 }
 0x2ad   : > { %v770_v3 = vmax.f32 %v722_v63, 0.0 }
 0x2ae   : > { %v801_v4 = vpack.c.bf16 %v772_v1, %v771_v0 }
 0x2af   : > { %v800_v5 = vpack.c.bf16 %v770_v3, %v769_v2  ;;  %v1278_v6 = vpop.f32.mrb[8].mxu1 }
 0x2b0   : > { %v743_v7 = vadd.f32 %v1278_v6, %v1147_v41  ;;  %v734_v8 = vpop.f32.mrb[9].mxu1 }
 0x2b1   : > { %v735_v9 = vadd.f32 %v1147_v41, %v734_v8  ;;  %v1279_v10 = vpop.f32.mrb[10].mxu1  ;;  %1304 = vmatprep.mubr.bf16.mxu0 %v800_v5 }
 0x2b2   : > { %v746_v11 = vadd.f32 %v1279_v10, %v1147_v41  ;;  %v737_v12 = vpop.f32.mrb[11].mxu1  ;;  %1305 = vmatmul.mubr.bf16.gmra.mrb[20].mxu0 %v801_v4  ;;  %v775_v14 = vmax.f32 %v743_v7, 0.0 }
 0x2b3   : > { %v738_v13 = vadd.f32 %v1147_v41, %v737_v12  ;;  %v773_v16 = vmax.f32 %v735_v9, 0.0 }
 0x2b4   : > { %v776_v15 = vmax.f32 %v746_v11, 0.0 }
 0x2b5   : > { %v774_v17 = vmax.f32 %v738_v13, 0.0 }
 0x2b6   : > { %v803_v18 = vpack.c.bf16 %v776_v15, %v775_v14 }
 0x2b7   : > { %v802_v19 = vpack.c.bf16 %v774_v17, %v773_v16  ;;  %v1282_v20 = vpop.f32.mrb[12].mxu1 }
 0x2b8   : > { %v759_v21 = vadd.f32 %v1282_v20, %v1147_v41  ;;  %v750_v22 = vpop.f32.mrb[13].mxu1 }
 0x2b9   : > { %v751_v23 = vadd.f32 %v1147_v41, %v750_v22  ;;  %v1283_v24 = vpop.f32.mrb[14].mxu1  ;;  %1308 = vmatprep.mubr.bf16.mxu1 %v802_v19 }
 0x2ba   : > { %v762_v25 = vadd.f32 %v1283_v24, %v1147_v41  ;;  %v753_v26 = vpop.f32.mrb[15].mxu1  ;;  %1309 = vmatmul.mubr.bf16.vlgmr.msra.gmra.mrb[16].mxu1 %v803_v18  ;;  %v779_v28 = vmax.f32 %v759_v21, 0.0 }
 0x2bb   : > { %v754_v27 = vadd.f32 %v1147_v41, %v753_v26  ;;  %v777_v30 = vmax.f32 %v751_v23, 0.0 }
 0x2bc   : > { %v780_v29 = vmax.f32 %v762_v25, 0.0 }
 0x2bd   : > { %v778_v31 = vmax.f32 %v754_v27, 0.0 }
 0x2be   : > { %v805_v32 = vpack.c.bf16 %v780_v29, %v779_v28 }
 0x2bf   : > { %v804_v33 = vpack.c.bf16 %v778_v31, %v777_v30 }
 0x2c1   : > { %1312 = vmatprep.mubr.bf16.mxu1 %v804_v33 }
 0x2c2   : > { %1313 = vmatmul.mubr.bf16.gmra.mrb[20].mxu1 %v805_v32 }
 0x37d   : > { %v1302_v35 = vpop.f32.mrb[16].mxu0 }
 0x37e   : > { %v903_v36 = vadd.f32 %v1302_v35, %v1156_v34  ;;  %v894_v37 = vpop.f32.mrb[17].mxu0 }
 0x37f   : > { %v895_v38 = vadd.f32 %v1156_v34, %v894_v37  ;;  %v1303_v39 = vpop.f32.mrb[18].mxu0 }
 0x380   : > { %959 = vst [vmem:[%s2143_s8 + $0x10] sm:$0xff] %v903_v36  ;;  %v906_v40 = vadd.f32 %v1303_v39, %v1156_v34  ;;  %v897_v41 = vpop.f32.mrb[19].mxu0 }
 0x381   : > { %957 = vst [vmem:[%s2143_s8] sm:$0xff] %v895_v38  ;;  %v898_v42 = vadd.f32 %v1156_v34, %v897_v41 }
 0x382   : > { %960 = vst [vmem:[%s2143_s8 + $0x18] sm:$0xff] %v906_v40 }
 0x383   : > { %958 = vst [vmem:[%s2143_s8 + $0x8] sm:$0xff] %v898_v42 }
 0x385   : > { %v1306_v43 = vpop.f32.mrb[20].mxu0 }
 0x386   : > { %v919_v44 = vadd.f32 %v1306_v43, %v1156_v34  ;;  %v910_v46 = vpop.f32.mrb[21].mxu0 }
 0x387   : > { %v911_v47 = vadd.f32 %v1156_v34, %v910_v46  ;;  %v1307_v48 = vpop.f32.mrb[22].mxu0 }
 0x388   : > { %963 = vst [vmem:[%s2143_s8 + $0x30] sm:$0xff] %v919_v44  ;;  %v922_v45 = vadd.f32 %v1307_v48, %v1156_v34  ;;  %v913_v49 = vpop.f32.mrb[23].mxu0 }
 0x389   : > { %961 = vst [vmem:[%s2143_s8 + $0x20] sm:$0xff] %v911_v47  ;;  %v914_v50 = vadd.f32 %v1156_v34, %v913_v49 }
 0x38a   : > { %964 = vst [vmem:[%s2143_s8 + $0x38] sm:$0xff] %v922_v45 }
 0x38b   : > { %962 = vst [vmem:[%s2143_s8 + $0x28] sm:$0xff] %v914_v50 }
 0x38d   : > { %v1310_v51 = vpop.f32.mrb[16].mxu1 }
 0x38e   : > { %v935_v52 = vadd.f32 %v1310_v51, %v1156_v34  ;;  %v926_v53 = vpop.f32.mrb[17].mxu1 }
 0x38f   : > { %v927_v54 = vadd.f32 %v1156_v34, %v926_v53  ;;  %v1311_v55 = vpop.f32.mrb[18].mxu1 }
 0x390   : > { %967 = vst [vmem:[%s2143_s8 + $0x50] sm:$0xff] %v935_v52  ;;  %v938_v56 = vadd.f32 %v1311_v55, %v1156_v34  ;;  %v929_v57 = vpop.f32.mrb[19].mxu1 }
 0x391   : > { %965 = vst [vmem:[%s2143_s8 + $0x40] sm:$0xff] %v927_v54  ;;  %v930_v58 = vadd.f32 %v1156_v34, %v929_v57 }
 0x392   : > { %968 = vst [vmem:[%s2143_s8 + $0x58] sm:$0xff] %v938_v56 }
 0x393   : > { %966 = vst [vmem:[%s2143_s8 + $0x48] sm:$0xff] %v930_v58 }
 0x395   : > { %v1314_v59 = vpop.f32.mrb[20].mxu1 }
 0x396   : > { %v951_v60 = vadd.f32 %v1314_v59, %v1156_v34  ;;  %v942_v61 = vpop.f32.mrb[21].mxu1 }
 0x397   : > { %v943_v62 = vadd.f32 %v1156_v34, %v942_v61  ;;  %v1315_v63 = vpop.f32.mrb[22].mxu1 }
 0x398   : > { %971 = vst [vmem:[%s2143_s8 + $0x70] sm:$0xff] %v951_v60  ;;  %v954_v0 = vadd.f32 %v1315_v63, %v1156_v34  ;;  %v945_v1 = vpop.f32.mrb[23].mxu1 }
 0x399   : > { %969 = vst [vmem:[%s2143_s8 + $0x60] sm:$0xff] %v943_v62  ;;  %v946_v2 = vadd.f32 %v1156_v34, %v945_v1 }
 0x39a   : > { %972 = vst [vmem:[%s2143_s8 + $0x78] sm:$0xff] %v954_v0 }
 0x39b   : > { %970 = vst [vmem:[%s2143_s8 + $0x68] sm:$0xff] %v946_v2 }
 0x39c   : > { %1680 = shalt.err (!%p1677_p8)
}
 0x39d   : > { %s1681_s14 = scalar_lea.hbm %s2163_s21, 2048  ;;  %s1685_s8 = scalar_lea.hbm %s2219_s7, 4096 }
 0x39e   : > { %p1682_p4 = scmp.ne.s32.totalorder %s2163_s21, %s1681_s14  ;;  %p1686_p0 = scmp.lt.u32.totalorder %s2163_s21, %s2219_s7 }
 0x39f   : > { %p1687_p5 = scmp.lt.u32.totalorder %s1685_s8, %s1681_s14  ;;  %p1689_p6 = scmp.lt.u32.totalorder %s1681_s14, %s2163_s21 }
 0x3a0   : > { %p1683_p10 = pnand %p1682_p4, %p2239_p9 }
 0x3a1   : > { %p1688_p7 = por %p1687_p5, %p1686_p0 }
 0x3a2   : > { %p1684_p11 = pneg %p1683_p10 }
 0x3a3   : > { %p1690_p12 = por %p1689_p6, %p1688_p7 }
 0x3a5   : > { %p1691_p13 = pnand %p1690_p12, %p1684_p11 }
 0x3a7   : > { %1694 = shalt.err (!%p1691_p13)
}
 0x3a8   : > { %s1759_s19 = smov 128   ;;  %s1760_s16 = smov 8  }
 0x3a9   : > { %1358 = dma.vmem_to_hbm [thread:$0]  (%p2239_p9), %s2165_s20, 2048, %s2163_s21, %s974_s30, %s1759_s19, %s1759_s19, %s1760_s16  }
 0x3aa PF: > { %s1002_s17 = sand.u32 1, %s1733_s24   ;;  %p2240_p1 = scmp.ne.s32.totalorder %s2230_s15, 0 }
 0x3ab   : > { %p2241_p3 = scmp.ge.s32.totalorder %s1745_s27, 2  ;;  %s1003_s13 = scalar_lea.sflag [#allocation4], %s1002_s17 }
 0x3ad   : > { %p1384_p2 = pnand %p2241_p3, %p2240_p1 }
 0x3af   : > { %1728 = dma.done.wait (!%p1384_p2), %s1003_s13, 2048  }
 0x3b0   : > { %1730 = vsyncadd (!%p1384_p2), %s1003_s13, 4294965248  ;;  %p23_p8 = scmp.ge.s32.totalorder %s1986_s11, 4   ;;  %s2242_s24 = smov %s1737_s25 }
 0x3b1   : > { %s2243_s25 = smov %s1741_s26  ;;  %s2244_s26 = smov %s1997_s23 }
 0x3b2   : > { %s2245_s27 = smov %s1986_s11  ;;  %25 = sbr.rel (!%p23_p8) target bundleno = 8 (0x8), region = 117 }
 0x3b9   :  { %1008 = vsyncpa [#allocation3], 1 }
 0x3ba   :  { %1010 = vsyncpa [#allocation3 + $0x1], 1 }
 0x3bb   :  { %1011 = vsyncpa [#allocation6], 1 }
 0x3bc   :  { %1012 = vsyncpa [#allocation9], 1 }
 0x3bd   :  { %1013 = vsyncpa [#allocation12], 1 }
 0x3be   :  { %1014 = vsyncpa [#allocation4], 1 }
 0x3bf   :  { %1016 = vsyncpa [#allocation4 + $0x1], 1 }

</bundles_post_ra>
